<compile_context>
chip_gen: v7x
topology: tpu7x:2x2x1
jax: 0.10.0
libtpu: 0.0.40
codegen_flags: <defaults>
</compile_context>

<pallas_src>
import functools

import jax
import jax.numpy as jnp
from jax import lax
from jax.experimental import pallas as pl
from jax.experimental.pallas import tpu as pltpu


_SQRT_HALF = 0.7071067811865476  # 1/sqrt(2), hoisted out of the GELU


def _gelu_exact_f32(h):
    # Exact (erf-based) GELU in f32, matching nn.GELU()'s default.
    return 0.5 * h * (1.0 + lax.erf(h * _SQRT_HALF))


def _mlp_kernel(x_ref, w1_ref, b1_ref, w2_ref, b2_ref, o_ref, acc_ref, *,
                compute_dtype):
    """Grid = (token tiles, hidden-dim reduction steps), nk > 1."""
    k = pl.program_id(1)

    @pl.when(k == 0)
    def _init():
        # Fold the fc2 bias into accumulator initialization.
        acc_ref[...] = jnp.broadcast_to(
            b2_ref[...].astype(jnp.float32), acc_ref.shape)

    # fc1 chunk: (tm, D) @ (D, th) + (1, th); MXU operands in compute_dtype,
    # f32 accumulation.
    h = jnp.dot(x_ref[...].astype(compute_dtype),
                w1_ref[...].astype(compute_dtype),
                preferred_element_type=jnp.float32)
    h = h + b1_ref[...].astype(jnp.float32)
    h = _gelu_exact_f32(h)
    # fc2 partial product over this hidden chunk: (tm, th) @ (th, O).
    acc_ref[...] += jnp.dot(h.astype(compute_dtype),
                            w2_ref[...].astype(compute_dtype),
                            preferred_element_type=jnp.float32)

    @pl.when(k == pl.num_programs(1) - 1)
    def _store():
        o_ref[...] = acc_ref[...].astype(o_ref.dtype)


def _mlp_kernel_single(x_ref, w1_ref, b1_ref, w2_ref, b2_ref, o_ref, *,
                       compute_dtype):
    """Single hidden chunk (nk == 1): no accumulator scratch needed."""
    h = jnp.dot(x_ref[...].astype(compute_dtype),
                w1_ref[...].astype(compute_dtype),
                preferred_element_type=jnp.float32)
    h = h + b1_ref[...].astype(jnp.float32)
    h = _gelu_exact_f32(h)
    out = jnp.dot(h.astype(compute_dtype),
                  w2_ref[...].astype(compute_dtype),
                  preferred_element_type=jnp.float32)
    out = out + b2_ref[...].astype(jnp.float32)
    o_ref[...] = out.astype(o_ref.dtype)


def _round_up(x, n):
    return ((x + n - 1) // n) * n


def _tpu_vmem_bytes():
    """Physical per-TensorCore VMEM; conservative 64 MiB fallback (v7x)."""
    try:
        info = pltpu.get_tpu_info()
        for attr in ("vmem_capacity_bytes", "vmem_size_bytes"):
            v = getattr(info, attr, None)
            if v:
                return int(v)
    except Exception:
        pass
    return 64 * 1024 * 1024


def _choose_th(hidden, d_in, d_out, itemsize, weight_budget_bytes):
    """Hidden-dim reduction tile: a multiple of 128 (lane width) or the full
    hidden dim, sized so double-buffered W1/W2 chunks fit the weight budget."""
    if hidden <= 512:
        return hidden
    divisible = [c for c in (4096, 2048, 1024, 512, 256, 128) if hidden % c == 0]
    if not divisible:
        return hidden
    for cand in divisible:
        if 2 * cand * (d_in + d_out) * itemsize <= weight_budget_bytes:
            return cand
    return divisible[-1]


def _choose_tm(m, d_in, d_out, th, itemsize, act_budget_bytes):
    """Token-tile rows from the remaining VMEM budget; 8-aligned, <= 1024,
    and >= 2 token tiles whenever M allows it (megacore / DMA overlap)."""
    if m <= 8:
        return 8
    # Bytes that scale with tm: double-buffered x and out tiles, f32
    # accumulator, and the f32 fc1/GELU intermediate.
    per_row = (itemsize * 2 * d_in          # x tiles (double-buffered)
               + itemsize * 2 * d_out       # out tiles (double-buffered)
               + 4 * d_out                  # f32 accumulator
               + 4 * th)                    # f32 fc1/GELU intermediate
    tm = int(min(1024, max(8, act_budget_bytes // max(per_row, 1))))
    tm = min(tm, _round_up(pl.cdiv(m, 2), 8))   # keep >= 2 token tiles
    tm = min(tm, _round_up(m, 8))
    return max(8, (tm // 8) * 8)


def _vmem_limit_bytes(tm, th, d_in, d_out, itemsize, out_itemsize, physical):
    est = (2 * tm * d_in * itemsize        # double-buffered x tiles
           + 2 * d_in * th * itemsize      # double-buffered W1 chunks
           + 2 * th * d_out * itemsize     # double-buffered W2 chunks
           + 2 * (th + d_out) * 4          # bias chunks
           + 2 * tm * d_out * out_itemsize # double-buffered output tiles
           + tm * d_out * 4                # f32 accumulator scratch
           + 2 * tm * th * 4)              # fc1 / GELU f32 intermediates
    est = int(est * 1.25)                  # headroom for compiler temps
    cap = int(physical * 0.85)             # keep Mosaic internal-scratch room
    return max(32 * 1024 * 1024, min(est, cap))


@functools.partial(jax.jit, static_argnames=("tm", "th", "compute_dtype"))
def mlp_pallas(x, w1, b1, w2, b2, tm=None, th=None, compute_dtype=None):
    """x: (..., D_in) -> (..., D_out).  Weights stored as (in, out).

    compute_dtype: MXU operand dtype (default: weight dtype).  Pass
    jnp.bfloat16 for mixed precision; accumulation is always f32.
    """
    orig_shape = x.shape
    d_in = orig_shape[-1]
    x2 = x.reshape(-1, d_in)
    m = x2.shape[0]
    hidden = w1.shape[1]
    d_out = w2.shape[1]

    out_dtype = x.dtype
    cd = jnp.dtype(compute_dtype) if compute_dtype is not None else jnp.dtype(w1.dtype)
    # Cast matmul operands to the compute dtype up front (halves the x /
    # weight HBM stream for bf16).  Biases stay in their original dtype and
    # are promoted to f32 inside the kernel.
    if x2.dtype != cd:
        x2 = x2.astype(cd)
    if w1.dtype != cd:
        w1 = w1.astype(cd)
    if w2.dtype != cd:
        w2 = w2.astype(cd)

    itemsize = cd.itemsize
    physical = _tpu_vmem_bytes()
    weight_budget = (physical * 3) // 8    # ~24 MiB on v7x, ~48 MiB on v5e/v6e
    act_budget = (physical * 3) // 8

    if th is None:
        th = _choose_th(hidden, d_in, d_out, itemsize, weight_budget)
    assert hidden % th == 0, (hidden, th)
    if tm is None:
        tm = _choose_tm(m, d_in, d_out, th, itemsize, act_budget)

    nk = hidden // th
    # pl.cdiv grid: the partial last token tile is masked by Pallas on
    # writeback; no host-side pad/slice copies of x or the output.
    grid = (pl.cdiv(m, tm), nk)

    b1_2d = b1.reshape(1, hidden)
    b2_2d = b2.reshape(1, d_out)

    in_specs = [
        pl.BlockSpec((tm, d_in), lambda i, k: (i, 0)),      # x tile
        pl.BlockSpec((d_in, th), lambda i, k: (0, k)),      # W1 chunk
        pl.BlockSpec((1, th), lambda i, k: (0, k)),         # b1 chunk
        pl.BlockSpec((th, d_out), lambda i, k: (k, 0)),     # W2 chunk
        pl.BlockSpec((1, d_out), lambda i, k: (0, 0)),      # b2
    ]
    out_spec = pl.BlockSpec((tm, d_out), lambda i, k: (i, 0))

    if nk == 1:
        kernel = functools.partial(_mlp_kernel_single, compute_dtype=cd)
        scratch = []
    else:
        kernel = functools.partial(_mlp_kernel, compute_dtype=cd)
        scratch = [pltpu.VMEM((tm, d_out), jnp.float32)]

    out = pl.pallas_call(
        kernel,
        out_shape=jax.ShapeDtypeStruct((m, d_out), out_dtype),
        grid_spec=pltpu.PrefetchScalarGridSpec(
            num_scalar_prefetch=0,
            grid=grid,
            in_specs=in_specs,
            out_specs=out_spec,
            scratch_shapes=scratch,
        ),
        compiler_params=pltpu.CompilerParams(
            dimension_semantics=("parallel", "arbitrary"),
            vmem_limit_bytes=_vmem_limit_bytes(
                tm, th, d_in, d_out, itemsize,
                jnp.dtype(out_dtype).itemsize, physical),
        ),
    )(x2, w1, b1_2d, w2, b2_2d)

    return out.reshape(*orig_shape[:-1], d_out)


def _init_linear(key, fan_in, fan_out, dtype=jnp.float32):
    """Deterministic init matching nn.Linear's uniform(-1/sqrt(fan_in), ...).
    PyTorch stores weight as (out, in); we keep (in, out) so the kernel can do
    x @ W directly (same math as x @ W_pt.T)."""
    kw, kb = jax.random.split(key)
    bound = 1.0 / float(jnp.sqrt(fan_in))
    w = jax.random.uniform(kw, (fan_in, fan_out), jnp.float32, -bound, bound)
    b = jax.random.uniform(kb, (fan_out,), jnp.float32, -bound, bound)
    return w.astype(dtype), b.astype(dtype)


def _mlp_reference(x, w1, b1, w2, b2):
    h = x @ w1 + b1
    h = jax.nn.gelu(h, approximate=False)   # exact erf GELU, like nn.GELU()
    return h @ w2 + b2


if __name__ == "__main__":
    key = jax.random.PRNGKey(0)
    k_x, k_fc1, k_fc2, k_x2, k_fc1b, k_fc2b, k_x3, k_fc1c, k_fc2c = (
        jax.random.split(key, 9))

    # --- shape implied by the module: (batch, seq, in_features), f32 ---
    batch, seq = 2, 8
    in_f, hid_f, out_f = 32, 64, 32

    x = jax.random.normal(k_x, (batch, seq, in_f), dtype=jnp.float32)
    w1, b1 = _init_linear(k_fc1, in_f, hid_f)
    w2, b2 = _init_linear(k_fc2, hid_f, out_f)

    y = mlp_pallas(x, w1, b1, w2, b2)
    jax.block_until_ready(y)
    assert y.shape == (batch, seq, out_f)
    y_ref = _mlp_reference(x, w1, b1, w2, b2)
    assert jnp.allclose(y, y_ref, atol=1e-4, rtol=1e-5), (
        float(jnp.max(jnp.abs(y - y_ref))))

    # --- second check: exercises the masked partial token tile (m % tm != 0)
    #     and the hidden-dim reduction axis (multiple k steps + f32 acc) ---
    m2, in2, hid2, out2 = 100, 48, 256, 64
    xb = jax.random.normal(k_x2, (m2, in2), dtype=jnp.float32)
    w1b, b1b = _init_linear(k_fc1b, in2, hid2)
    w2b, b2b = _init_linear(k_fc2b, hid2, out2)
    yb = mlp_pallas(xb, w1b, b1b, w2b, b2b, th=128)
    jax.block_until_ready(yb)
    yb_ref = _mlp_reference(xb, w1b, b1b, w2b, b2b)
    assert yb.shape == (m2, out2)
    assert jnp.allclose(yb, yb_ref, atol=1e-4, rtol=1e-5), (
        float(jnp.max(jnp.abs(yb - yb_ref))))

    # --- third check: bf16 mixed-precision path (bf16 MXU operands, f32
    #     accumulation); reference computed in f32 from the bf16 operands ---
    m3, in3, hid3, out3 = 64, 128, 512, 128
    xc = jax.random.normal(k_x3, (m3, in3), dtype=jnp.float32).astype(jnp.bfloat16)
    w1c, b1c = _init_linear(k_fc1c, in3, hid3, dtype=jnp.bfloat16)
    w2c, b2c = _init_linear(k_fc2c, hid3, out3, dtype=jnp.bfloat16)
    yc = mlp_pallas(xc, w1c, b1c, w2c, b2c)
    jax.block_until_ready(yc)
    yc_ref = _mlp_reference(xc.astype(jnp.float32), w1c.astype(jnp.float32),
                            b1c.astype(jnp.float32), w2c.astype(jnp.float32),
                            b2c.astype(jnp.float32))
    assert yc.shape == (m3, out3)
    assert jnp.allclose(yc.astype(jnp.float32), yc_ref, atol=1e-1, rtol=1e-1), (
        float(jnp.max(jnp.abs(yc.astype(jnp.float32) - yc_ref))))

    print("KERNEL_OK")
</pallas_src>

<mosaic_0001>
module attributes {stable_mosaic.version = 11 : i64} {
  func.func @_mlp_kernel_single(%arg0: i32, %arg1: i32, %arg2: memref<8x32xf32, #tpu.memory_space<vmem>>, %arg3: memref<32x64xf32, #tpu.memory_space<vmem>>, %arg4: memref<1x64xf32, #tpu.memory_space<vmem>>, %arg5: memref<64x32xf32, #tpu.memory_space<vmem>>, %arg6: memref<1x32xf32, #tpu.memory_space<vmem>>, %arg7: memref<8x32xf32, #tpu.memory_space<vmem>>) attributes {dimension_semantics = [#tpu.dimension_semantics<parallel>, #tpu.dimension_semantics<arbitrary>], iteration_bounds = array<i64: 2, 1>, scalar_prefetch = 0 : i64, scratch_operands = 0 : i64, tpu.core_type = #tpu.core_type<tc>, window_params = [{transform_indices = @transform_0, window_bounds = array<i64: 8, 32>}, {transform_indices = @transform_1, window_bounds = array<i64: 32, 64>}, {transform_indices = @transform_2, window_bounds = array<i64: 1, 64>}, {transform_indices = @transform_3, window_bounds = array<i64: 64, 32>}, {pipeline_mode = #tpu.pipeline_mode<synchronous>, transform_indices = @transform_4, window_bounds = array<i64: 1, 32>}, {transform_indices = @transform_5, window_bounds = array<i64: 8, 32>}]} {
    %c0 = arith.constant 0 : index
    %c0_0 = arith.constant 0 : index
    %0 = vector.load %arg2[%c0, %c0_0] : memref<8x32xf32, #tpu.memory_space<vmem>>, vector<8x32xf32>
    %c0_1 = arith.constant 0 : index
    %c0_2 = arith.constant 0 : index
    %1 = vector.load %arg3[%c0_1, %c0_2] : memref<32x64xf32, #tpu.memory_space<vmem>>, vector<32x64xf32>
    %cst = arith.constant dense<0.000000e+00> : vector<8x64xf32>
    %2 = tpu.matmul %0, %1, %cst {dimension_numbers = #tpu.dot_dimension_numbers<[1], [0], [0], [1], [0, 0, 1, 1], [], []>} : vector<8x32xf32>, vector<32x64xf32>, vector<8x64xf32> -> vector<8x64xf32>
    %c0_3 = arith.constant 0 : index
    %c0_4 = arith.constant 0 : index
    %3 = vector.load %arg4[%c0_3, %c0_4] : memref<1x64xf32, #tpu.memory_space<vmem>>, vector<1x64xf32>
    %4 = vector.broadcast %3 : vector<1x64xf32> to vector<8x64xf32>
    %5 = arith.addf %2, %4 : vector<8x64xf32>
    %cst_5 = arith.constant 5.000000e-01 : f32
    %6 = vector.broadcast %cst_5 : f32 to vector<8x64xf32>
    %7 = arith.mulf %6, %5 : vector<8x64xf32>
    %cst_6 = arith.constant 0.707106769 : f32
    %8 = vector.broadcast %cst_6 : f32 to vector<8x64xf32>
    %9 = arith.mulf %5, %8 : vector<8x64xf32>
    %10 = math.erf %9 : vector<8x64xf32>
    %cst_7 = arith.constant 1.000000e+00 : f32
    %11 = vector.broadcast %cst_7 : f32 to vector<8x64xf32>
    %12 = arith.addf %11, %10 : vector<8x64xf32>
    %13 = arith.mulf %7, %12 : vector<8x64xf32>
    %c0_8 = arith.constant 0 : index
    %c0_9 = arith.constant 0 : index
    %14 = vector.load %arg5[%c0_8, %c0_9] : memref<64x32xf32, #tpu.memory_space<vmem>>, vector<64x32xf32>
    %cst_10 = arith.constant dense<0.000000e+00> : vector<8x32xf32>
    %15 = tpu.matmul %13, %14, %cst_10 {dimension_numbers = #tpu.dot_dimension_numbers<[1], [0], [0], [1], [0, 0, 1, 1], [], []>} : vector<8x64xf32>, vector<64x32xf32>, vector<8x32xf32> -> vector<8x32xf32>
    %c0_11 = arith.constant 0 : index
    %c0_12 = arith.constant 0 : index
    %16 = vector.load %arg6[%c0_11, %c0_12] : memref<1x32xf32, #tpu.memory_space<vmem>>, vector<1x32xf32>
    %17 = vector.broadcast %16 : vector<1x32xf32> to vector<8x32xf32>
    %18 = arith.addf %15, %17 : vector<8x32xf32>
    %c0_13 = arith.constant 0 : index
    %c0_14 = arith.constant 0 : index
    %19 = vector.load %arg7[%c0_13, %c0_14] : memref<8x32xf32, #tpu.memory_space<vmem>>, vector<8x32xf32>
    tpu.vector_store %arg7[%c0_13, %c0_14], %18 {strides = array<i32>} : memref<8x32xf32, #tpu.memory_space<vmem>>, vector<8x32xf32>,
    return
  }
  func.func @transform_0(%arg0: i32, %arg1: i32) -> (i32, i32) {
    %c0_i32 = arith.constant 0 : i32
    %c0_i32_0 = arith.constant 0 : i32
    return %arg0, %c0_i32 : i32, i32
  }
  func.func @transform_1(%arg0: i32, %arg1: i32) -> (i32, i32) {
    %c0_i32 = arith.constant 0 : i32
    %c0_i32_0 = arith.constant 0 : i32
    return %c0_i32, %arg1 : i32, i32
  }
  func.func @transform_2(%arg0: i32, %arg1: i32) -> (i32, i32) {
    %c0_i32 = arith.constant 0 : i32
    %c0_i32_0 = arith.constant 0 : i32
    return %c0_i32, %arg1 : i32, i32
  }
  func.func @transform_3(%arg0: i32, %arg1: i32) -> (i32, i32) {
    %c0_i32 = arith.constant 0 : i32
    %c0_i32_0 = arith.constant 0 : i32
    return %arg1, %c0_i32 : i32, i32
  }
  func.func @transform_4(%arg0: i32, %arg1: i32) -> (i32, i32) {
    %c0_i32 = arith.constant 0 : i32
    %c0_i32_0 = arith.constant 0 : i32
    %c0_i32_1 = arith.constant 0 : i32
    return %c0_i32, %c0_i32_0 : i32, i32
  }
  func.func @transform_5(%arg0: i32, %arg1: i32) -> (i32, i32) {
    %c0_i32 = arith.constant 0 : i32
    %c0_i32_0 = arith.constant 0 : i32
    return %arg0, %c0_i32 : i32, i32
  }
}

</mosaic_0001>

<bundles_post_ra>
// kernel: mlp_pallas.1
= control target key start
LH: loop header
LB: loop body
LE: loop exit
PB: predicated region body
PF: predicated region fallthrough
CT: control target
= control target key end

     0   :  { %10 = vsyncpa [#allocation3], 0  ;;  %s999_s0 = inlined_call_operand.vmem [shape: f32[16,32], index: 0, kind: input, shape index: {}]   ;;  %s1000_s1 = inlined_call_operand.vmem [shape: f32[32,64], index: 1, kind: input, shape index: {}]   ;;  %s1001_s2 = inlined_call_operand.vmem [shape: f32[1,64], index: 2, kind: input, shape index: {}]   ;;  %s1002_s3 = inlined_call_operand.vmem [shape: f32[64,32], index: 3, kind: input, shape index: {}]   ;;  %s1003_s4 = inlined_call_operand.vmem [shape: f32[1,32], index: 4, kind: input, shape index: {}]   ;;  %s1004_s5 = inlined_call_operand.hbm [shape: f32[16,32], index: 5, kind: output, shape index: {}]  }
   0x1   :  { %12 = vsyncpa [#allocation3 + $0x1], 0  ;;  %s843_s18 = smov 0   ;;  %s845_s19 = smov 0  }
   0x2   :  { %s847_s20 = smov 0   ;;  %s849_s21 = smov 0  }
   0x3   :  { %s851_s22 = smov 0   ;;  %s853_s23 = smov 0  }
   0x4 LB: > { %s589_s24 = sadd.s32 4294967295, %s807_s23   ;;  %s590_s25 = sadd.s32 4294967294, %s807_s23   ;;  %s807_s23 = sphi %s853_s23, %s18_s23   ;;  %s803_s22 = sphi %s851_s22, %s1011_s22   ;;  %s799_s21 = sphi %s849_s21, %s1010_s21   ;;  %s795_s20 = sphi %s847_s20, %s1009_s20   ;;  %s791_s19 = sphi %s845_s19, %s1008_s19   ;;  %s787_s18 = sphi %s843_s18, %s1007_s18  }
   0x5   : > { %s30_s26 = sadd.s32 1, %s803_s22  ;;  %s162_s27 = sadd.s32 1, %s795_s20 }
   0x6   : > { %p32_p0 = scmp.ge.s32.totalorder %s30_s26, 2  ;;  %p172_p1 = scmp.ne.s32.totalorder %s795_s20, %s791_s19 }
   0x7   : > { %p173_p2 = scmp.eq.s32.totalorder %s589_s24, 1  ;;  %p178_p3 = scmp.ne.s32.totalorder %s791_s19, %s787_s18 }
   0x8   : > { %s1013_s26 = smov (%p32_p0, %s30_s26), 0  ;;  %p179_p5 = scmp.eq.s32.totalorder %s590_s25, 1 }
   0x9   : > { %p883_p4 = por %p173_p2, %p172_p1  ;;  %s159_s29 = ssub.s32 %s803_s22, %s1013_s26 }
   0xa   : > { %p596_p6 = scmp.ge.s32.totalorder %s807_s23, 1  ;;  %p160_p7 = scmp.eq.s32.totalorder %s159_s29, 0 }
   0xb   : > { %p890_p8 = por %p179_p5, %p178_p3  ;;  %p229_p9 = scmp.lt.s32.totalorder %s807_s23, 3 }
   0xc   : > { %s896_s6 = scalar_select %p160_p7, %s795_s20, %s162_s27  }
   0xd   : > { %p230_p10 = pnand %p596_p6, %p229_p9 }
   0xe   : > { %v286_v0 = vld [vmem:[%s1000_s1] sm:$0xff] (!%p230_p10)  ;;  %v287_v1 = vld [vmem:[%s1000_s1 + $0x8] sm:$0xff] (!%p230_p10)  ;;  %v288_v2 = vld [vmem:[%s1000_s1 + $0x10] sm:$0xff] (!%p230_p10)  ;;  %v809_v3 = vmov (!%p230_p10), 0.0|0.0   ;;  %vm810_vm0 = vmmov (!%p230_p10), 0   ;;  %v811_v6 = vmov (!%p230_p10), 0.0  }
   0xf   : > { %233 = sbr.rel (%p230_p10) target bundleno = 486 (0x1e6), region = 40  ;;  %651 = vmatprep.subr.bf16.mxu0 (!%p230_p10), %v809_v3  ;;  %v652_v4 = vpack.c.bf16 (!%p230_p10), %v287_v1, %v286_v0  ;;  %v289_v5 = vld [vmem:[%s1000_s1 + $0x18] sm:$0xff] (!%p230_p10)  ;;  %629 = vmatprep.mubr.msk.f32.mxu0 (!%p230_p10), %vm810_vm0, %v811_v6  ;;  %p268_p11 = scmp.lt.s32.totalorder (!%p230_p10), %s799_s21, 1  ;;  %vm297_vm1 = vcmask (!%p230_p10), 261120   ;;  %v376_v9 = vld [vmem:[%s1002_s3] sm:$0xff] (!%p230_p10)  ;;  %v377_v10 = vld [vmem:[%s1002_s3 + $0x8] sm:$0xff] (!%p230_p10) }
  0x10   : > { %657 = vmatprep.subr.bf16.mxu1 (!%p230_p10), %v809_v3  ;;  %648 = vmatprep.mubr.msk.f32.mxu1 (!%p230_p10), %vm810_vm0, %v811_v6  ;;  %v655_v7 = vpack.c.bf16 (!%p230_p10), %v289_v5, %v288_v2  ;;  %v658_v11 = vpack.c.bf16 (!%p230_p10), %v377_v10, %v376_v9  ;;  %v378_v12 = vld [vmem:[%s1002_s3 + $0x10] sm:$0xff] (!%p230_p10)  ;;  %v379_v13 = vld [vmem:[%s1002_s3 + $0x18] sm:$0xff] (!%p230_p10)  ;;  %v380_v15 = vld [vmem:[%s1002_s3 + $0x20] sm:$0xff] (!%p230_p10)  ;;  %vm391_vm2 = vcmask (!%p230_p10), 523264   ;;  %s265_s8 = sand.u32 (!%p230_p10), 1, %s791_s19   ;;  %s604_s12 = sshll.u32 (!%p230_p10), %s799_s21, 7 }
  0x11   : > { %653 = vmatpush3.bf16.msra.mxu0 (!%p230_p10), %v652_v4  ;;  %v661_v14 = vpack.c.bf16 (!%p230_p10), %v379_v13, %v378_v12  ;;  %v381_v16 = vld [vmem:[%s1002_s3 + $0x28] sm:$0xff] (!%p230_p10)  ;;  %v382_v18 = vld [vmem:[%s1002_s3 + $0x30] sm:$0xff] (!%p230_p10)  ;;  %v383_v19 = vld [vmem:[%s1002_s3 + $0x38] sm:$0xff] (!%p230_p10)  ;;  %s597_s9 = sshll.u32 (!%p230_p10), %s265_s8, 3  ;;  %s951_s17 = scalar_lea.hbm (!%p230_p10), %s1004_s5, %s604_s12 }
  0x12   : > { %654 = vmatprep.subr.bf16.mxu0 (!%p230_p10), %v809_v3  ;;  %659 = vmatpush3.bf16.msra.mxu1 (!%p230_p10), %v658_v11  ;;  %v664_v17 = vpack.c.bf16 (!%p230_p10), %v381_v16, %v380_v15  ;;  %v667_v20 = vpack.c.bf16 (!%p230_p10), %v383_v19, %v382_v18  ;;  %v599_v21 = vld [vmem:[%s1001_s2] ss:$0 sm:$0xff] (!%p230_p10)  ;;  %s267_s13 = scalar_lea.vmem (!%p230_p10), [#allocation2], %s597_s9  ;;  %s467_s24 = scalar_lea.sflag (!%p230_p10), [#allocation3], %s265_s8 }
  0x13   : > { %660 = vmatprep.subr.bf16.mxu1 (!%p230_p10), %v809_v3  ;;  %v601_v30 = vld [vmem:[%s1003_s4] ss:$0 sm:$0xff] (!%p230_p10)  ;;  %s480_s14 = sshll.u32 (!%p230_p10), %s267_s13, 4  ;;  %s953_s14 = int_to_ptr.vmem [resolvable:$true] %s480_s14 }
  0x15   : > { %656 = vmatpush3.bf16.msra.mxu0 (!%p230_p10), %v655_v7 }
  0x16   : > { %s269_s15 = scalar_select %p268_p11, %s799_s21, 1  ;;  %662 = vmatpush3.bf16.msra.mxu1 %v661_v14 }
  0x17   : > { %663 = vmatprep.subr.bf16.mxu1 %v809_v3  ;;  %s812_s21 = smov [#allocation2]  }
  0x18   : > { %s598_s16 = sshll.u32 %s269_s15, 3  ;;  %s733_s27 = sshll.u32 %s812_s21, 4  ;;  %s734_s27 = int_to_ptr.vmem [resolvable:$false] %s733_s27 }
  0x19   : > { %s271_s25 = scalar_lea.vmem %s999_s0, %s598_s16  ;;  %s735_s29 = scalar_lea.vmem %s734_s27, 256 }
  0x1a   : > { %v285_v8 = vld [vmem:[%s271_s25] sm:$0xff]  ;;  %665 = vmatpush3.bf16.msra.mxu1 %v664_v17  ;;  %s729_s25 = scalar_lea.vmem %s953_s14, 128  ;;  %p736_p1 = scmp.lt.s32.totalorder %s953_s14, %s734_s27 }
  0x1b   : > { %630 = vmatmul.mubr.msk.f32.vlgmr.msra.gmra.mrb[0].mxu0 %vm297_vm1, %v285_v8  ;;  %666 = vmatprep.subr.bf16.mxu1 %v809_v3  ;;  %p730_p12 = scmp.ne.s32.totalorder %s953_s14, %s729_s25  ;;  %p737_p2 = scmp.lt.s32.totalorder %s735_s29, %s729_s25 }
  0x1d   : > { %p731_p13 = pnand %p730_p12, %p883_p4  ;;  %p738_p3 = por %p737_p2, %p736_p1 }
  0x1e   : > { %668 = vmatpush3.bf16.msra.mxu1 %v667_v20 }
  0x1f   : > { %p732_p0 = pneg %p731_p13 }
  0x21   : > { %p739_p5 = pnand %p738_p3, %p732_p0 }
  0xee   : > { %v367_v22 = vpop.f32.mrb[0].mxu0 }
  0xef   : > { %v368_v23 = vadd.f32 %v599_v21, %v367_v22  ;;  %v631_v24 = vpop.f32.mrb[1].mxu0 }
  0xf1   : > { %v372_v25 = vmul.f32 0.70710677, %v368_v23  ;;  %v371_v27 = vmul.f32 0.5, %v368_v23 }
  0xf3   : > { %727 = verf.f32 %v372_v25 }
  0xfd   : > { %v728_v26 = vpop.eup %727 }
  0xfe   : > { %v374_v28 = vadd.f32 1.0, %v728_v26 }
 0x100   : > { %v375_v29 = vmul.f32 %v374_v28, %v371_v27 }
 0x102   : > { %649 = vmatmul.mubr.msk.f32.vlgmr.msra.gmra.mrb[0].mxu1 %vm391_vm2, %v375_v29 }
 0x1d5   : > { %v461_v31 = vpop.f32.mrb[0].mxu1 }
 0x1d6   : > { %v462_v32 = vadd.f32 %v601_v30, %v461_v31  ;;  %v650_v33 = vpop.f32.mrb[1].mxu1 }
 0x1d8   : > { %465 = vst.msk [vmem:[%s267_s13] sm:$0xff] %vm297_vm1, %v462_v32 }
 0x1d9   : > { %742 = shalt.err (!%p739_p5)
}
 0x1da   : > { %s743_s7 = scalar_lea.hbm %s951_s17, 128  ;;  %s747_s10 = scalar_lea.hbm %s1004_s5, 256 }
 0x1db   : > { %p744_p6 = scmp.ne.s32.totalorder %s951_s17, %s743_s7  ;;  %p748_p10 = scmp.lt.u32.totalorder %s951_s17, %s1004_s5 }
 0x1dc   : > { %p749_p11 = scmp.lt.u32.totalorder %s747_s10, %s743_s7  ;;  %p751_p13 = scmp.lt.u32.totalorder %s743_s7, %s951_s17 }
 0x1dd   : > { %p745_p7 = pnand %p744_p6, %p883_p4 }
 0x1de   : > { %p750_p12 = por %p749_p11, %p748_p10 }
 0x1df   : > { %p746_p9 = pneg %p745_p7 }
 0x1e0   : > { %p752_p0 = por %p751_p13, %p750_p12 }
 0x1e2   : > { %p753_p1 = pnand %p752_p0, %p746_p9 }
 0x1e4   : > { %756 = shalt.err (!%p753_p1)
}
 0x1e5   : > { %669 = dma.vmem_to_hbm [thread:$0]  (%p883_p4), %s953_s14, 128, %s951_s17, %s467_s24  }
 0x1e6 PF: > { %p675_p2 = scmp.ge.s32.totalorder %s807_s23, 2  ;;  %s492_s13 = sand.u32 1, %s787_s18  }
 0x1e7   : > { %s493_s15 = scalar_lea.sflag [#allocation3], %s492_s13 }
 0x1e8   : > { %p672_p3 = pnand %p675_p2, %p890_p8 }
 0x1ea   : > { %782 = dma.done.wait (!%p672_p3), %s493_s15, 128  }
 0x1eb   : > { %784 = vsyncadd (!%p672_p3), %s493_s15, 4294967168  ;;  %s18_s23 = sadd.s32 1, %s807_s23   ;;  %s1007_s18 = smov %s791_s19 }
 0x1ec   : > { %p15_p5 = scmp.ge.s32.totalorder %s18_s23, 4   ;;  %s1008_s19 = smov %s795_s20 }
 0x1ed   : > { %s1009_s20 = smov %s896_s6  ;;  %s1010_s21 = smov %s803_s22 }
 0x1ee   : > { %s1011_s22 = smov %s1013_s26  ;;  %17 = sbr.rel (!%p15_p5) target bundleno = 4 (0x4), region = 84 }
 0x1f5   :  { %498 = vsyncpa [#allocation3], 1 }
 0x1f6   :  { %500 = vsyncpa [#allocation3 + $0x1], 1 }

</bundles_post_ra>
